<compile_context>
chip_gen: v5e
topology: v5e:2x2
jax: 0.10.0
libtpu: 0.0.40
codegen_flags: <defaults>
</compile_context>

<pallas_src>
import functools

import jax
import jax.numpy as jnp
import numpy as np
from jax.experimental import pallas as pl
from jax.experimental.pallas import tpu as pltpu


def _round_up(x, m):
    return ((x + m - 1) // m) * m


def _physical_vmem_bytes():
    """Per-core VMEM capacity; conservative v7x fallback if the query fails."""
    try:
        return int(pltpu.get_tpu_info().vmem_capacity_bytes)
    except Exception:
        return 64 << 20


def _tile_bytes(tm, tn, dp, in_isz, out_isz):
    """Double-buffered per-step VMEM working set, incl. f32 intermediates."""
    buffered = 2 * (tm * dp            # x tile
                    + 2 * dp * tn      # two weight blocks
                    + 2 * tn) * in_isz  # two bias blocks
    buffered += 2 * 2 * tm * tn * out_isz   # two output tiles, double-buffered
    interm = 2 * tm * tn * 4                # zm / zr f32 matmul results
    return buffered + interm


def _softplus(x):
    # Numerically stable softplus (torch.nn.functional.softplus, beta=1):
    # max(x, 0) + log1p(exp(-|x|)).  exp/log1p land on the EUP slot.
    return jnp.maximum(x, 0.0) + jnp.log1p(jnp.exp(-jnp.abs(x)))


def _nb_output_kernel(x_ref, wm_ref, wr_ref, bm_ref, br_ref, m_ref, logr_ref):
    """One (tm, tn) tile per head: two matmuls + bias + softplus, direct stores."""
    x = x_ref[...]
    zm = jnp.dot(x, wm_ref[...], preferred_element_type=jnp.float32) + bm_ref[...]
    zr = jnp.dot(x, wr_ref[...], preferred_element_type=jnp.float32) + br_ref[...]
    if jnp.dtype(m_ref.dtype).itemsize < 4:
        # bf16 outputs: evaluate softplus at output precision (bf16 EUP on
        # v6e/v7x runs ~2x f32 rate; error is within output precision anyway).
        zm = zm.astype(m_ref.dtype)
        zr = zr.astype(logr_ref.dtype)
    m_ref[...] = _softplus(zm).astype(m_ref.dtype)
    logr_ref[...] = _softplus(zr).astype(logr_ref.dtype)


@functools.partial(jax.jit, static_argnames=("tm", "tn", "out_dtype"))
def nb_full_dispersion_forward(x, w_means, b_means, w_r, b_r, *,
                               tm=None, tn=None, out_dtype=None):
    """Pallas implementation of OutputModuleNBFullDispersion.forward.

    Args:
      x:        (B, D)  input activations.
      w_means:  (D, G)  means-layer weight (transposed vs. nn.Linear).
      b_means:  (G,)    means-layer bias.
      w_r:      (D, G)  r-values-layer weight (transposed vs. nn.Linear).
      b_r:      (G,)    r-values-layer bias.
      tm, tn:   batch / gene tile sizes (None -> generation-dependent default,
                clamped to the padded problem and to the VMEM budget).
      out_dtype: output dtype (default: x.dtype). Strongly recommended:
                 jnp.bfloat16 — halves the dominant output HBM stream.

    Returns:
      (m, log_r), each of shape (B, G).
    """
    B, D = x.shape
    G = w_means.shape[1]
    out_dtype = jnp.dtype(x.dtype) if out_dtype is None else jnp.dtype(out_dtype)
    in_isz = jnp.dtype(x.dtype).itemsize
    out_isz = out_dtype.itemsize

    # --- Generation-aware VMEM budget. ---
    vmem_phys = _physical_vmem_bytes()
    vmem_cap = int(vmem_phys * 0.85)      # headroom for Mosaic internal scratch

    # Sub-32-bit outputs pack along sublanes: keep tm at the native packing.
    m_align = 16 if out_isz < 4 else 8

    if tm is None:
        tm = 512 if vmem_phys > (96 << 20) else 256   # bigger tiles on v5e/v6e
    if tn is None:
        tn = 512

    # Lane-align the contraction dim.
    Dp = _round_up(D, 128)

    # --- Tile sizes: clamp to (padded) problem, keep HW alignment. ---
    tm_eff = _round_up(min(int(tm), _round_up(B, m_align)), m_align)
    tn_eff = _round_up(min(int(tn), _round_up(G, 128)), 128)

    # Shrink tiles until the double-buffered working set fits the VMEM cap
    # (matters for large D on v7x's 64 MiB VMEM).
    while _tile_bytes(tm_eff, tn_eff, Dp, in_isz, out_isz) > vmem_cap and tn_eff > 128:
        tn_eff = max(128, _round_up(tn_eff // 2, 128))
    while _tile_bytes(tm_eff, tn_eff, Dp, in_isz, out_isz) > vmem_cap and tm_eff > m_align:
        tm_eff = max(m_align, _round_up(tm_eff // 2, m_align))

    Bp = _round_up(B, tm_eff)
    Gp = _round_up(G, tn_eff)
    n_bt = Bp // tm_eff
    n_gt = Gp // tn_eff

    # --- Megacore (v7x has 2 TensorCores): guarantee >= 2 grid steps. ---
    if n_gt * n_bt == 1:
        if tm_eff >= 2 * m_align:
            tm_eff = _round_up(tm_eff // 2, m_align)
        elif tn_eff >= 256:
            tn_eff = _round_up(tn_eff // 2, 128)
        Bp = _round_up(B, tm_eff)
        Gp = _round_up(G, tn_eff)
        n_bt = Bp // tm_eff
        n_gt = Gp // tn_eff

    # --- Wrapper-side padding (no hard asserts for unpadded shapes). ---
    x_p = x if (Bp == B and Dp == D) else jnp.pad(x, ((0, Bp - B), (0, Dp - D)))
    wm_p = w_means if (Dp == D and Gp == G) else jnp.pad(w_means, ((0, Dp - D), (0, Gp - G)))
    wr_p = w_r if (Dp == D and Gp == G) else jnp.pad(w_r, ((0, Dp - D), (0, Gp - G)))
    bm_p = (b_means if Gp == G else jnp.pad(b_means, (0, Gp - G))).reshape(1, Gp)
    br_p = (b_r if Gp == G else jnp.pad(b_r, (0, Gp - G))).reshape(1, Gp)

    # --- Grid: gene tiles OUTER, batch tiles INNER -> weight blocks resident. ---
    grid = (n_gt, n_bt)

    in_specs = [
        pl.BlockSpec((tm_eff, Dp), lambda j, i: (i, 0)),     # x tile (inner step)
        pl.BlockSpec((Dp, tn_eff), lambda j, i: (0, j)),     # W_means block (outer only)
        pl.BlockSpec((Dp, tn_eff), lambda j, i: (0, j)),     # W_r block     (outer only)
        pl.BlockSpec((1, tn_eff), lambda j, i: (0, j)),      # b_means block (outer only)
        pl.BlockSpec((1, tn_eff), lambda j, i: (0, j)),      # b_r block     (outer only)
    ]
    out_specs = (
        pl.BlockSpec((tm_eff, tn_eff), lambda j, i: (i, j)),  # m
        pl.BlockSpec((tm_eff, tn_eff), lambda j, i: (i, j)),  # log_r
    )
    out_shapes = (
        jax.ShapeDtypeStruct((Bp, Gp), out_dtype),
        jax.ShapeDtypeStruct((Bp, Gp), out_dtype),
    )

    need = _tile_bytes(tm_eff, tn_eff, Dp, in_isz, out_isz)
    vmem_limit = int(min(max(need + (4 << 20), 32 << 20), vmem_cap))

    cost = pl.CostEstimate(
        flops=2 * 2 * Bp * Dp * Gp,            # two matmuls
        transcendentals=2 * 2 * Bp * Gp,       # exp + log1p per output element
        bytes_accessed=(Bp * Dp + 2 * Dp * Gp + 2 * Gp) * in_isz
        + 2 * Bp * Gp * out_isz,
    )

    m_p, logr_p = pl.pallas_call(
        _nb_output_kernel,
        out_shape=out_shapes,
        grid_spec=pltpu.PrefetchScalarGridSpec(
            num_scalar_prefetch=0,
            grid=grid,
            in_specs=in_specs,
            out_specs=out_specs,
        ),
        compiler_params=pltpu.CompilerParams(
            dimension_semantics=("parallel", "parallel"),
            vmem_limit_bytes=vmem_limit,
        ),
        cost_estimate=cost,
    )(x_p, wm_p, wr_p, bm_p, br_p)

    return m_p[:B, :G], logr_p[:B, :G]


def _reference_forward(x, w_means, b_means, w_r, b_r):
    m = jax.nn.softplus(x @ w_means + b_means)
    log_r = jax.nn.softplus(x @ w_r + b_r)
    return m, log_r


def _make_inputs(key, batch, input_dim, output_dim):
    kx, kwm, kbm, kwr, kbr = jax.random.split(key, 5)
    bound = 1.0 / np.sqrt(input_dim)
    x = jax.random.normal(kx, (batch, input_dim), dtype=jnp.float32)
    w_means = jax.random.uniform(kwm, (input_dim, output_dim), jnp.float32, -bound, bound)
    b_means = jax.random.uniform(kbm, (output_dim,), jnp.float32, -bound, bound)
    w_r = jax.random.uniform(kwr, (input_dim, output_dim), jnp.float32, -bound, bound)
    b_r = jax.random.uniform(kbr, (output_dim,), jnp.float32, -bound, bound)
    return x, w_means, b_means, w_r, b_r


if __name__ == "__main__":
    key = jax.random.PRNGKey(0)
    k1, k2 = jax.random.split(key)

    # Small, tile-aligned case: latent dim 32 -> 256 genes, batch 8.
    args = _make_inputs(k1, batch=8, input_dim=32, output_dim=256)
    m, log_r = nb_full_dispersion_forward(*args)
    jax.block_until_ready((m, log_r))
    m_ref, log_r_ref = _reference_forward(*args)
    np.testing.assert_allclose(np.asarray(m), np.asarray(m_ref), rtol=1e-5, atol=1e-5)
    np.testing.assert_allclose(np.asarray(log_r), np.asarray(log_r_ref), rtol=1e-5, atol=1e-5)

    # Non-aligned case to exercise wrapper-side padding.
    args2 = _make_inputs(k2, batch=10, input_dim=50, output_dim=300)
    m2, log_r2 = nb_full_dispersion_forward(*args2)
    jax.block_until_ready((m2, log_r2))
    m2_ref, log_r2_ref = _reference_forward(*args2)
    np.testing.assert_allclose(np.asarray(m2), np.asarray(m2_ref), rtol=2e-5, atol=2e-5)
    np.testing.assert_allclose(np.asarray(log_r2), np.asarray(log_r2_ref), rtol=2e-5, atol=2e-5)

    # bf16-output path (halves the dominant output HBM stream; bf16 softplus).
    m3, log_r3 = nb_full_dispersion_forward(*args, out_dtype=jnp.bfloat16)
    jax.block_until_ready((m3, log_r3))
    np.testing.assert_allclose(np.asarray(m3, dtype=np.float32), np.asarray(m_ref),
                               rtol=2e-2, atol=2e-2)
    np.testing.assert_allclose(np.asarray(log_r3, dtype=np.float32), np.asarray(log_r_ref),
                               rtol=2e-2, atol=2e-2)

    # TODO(synk): log_prob / loss (lgamma-based NB log-pmf) and sample (NB
    # sampling) are not part of forward(); not implemented as Pallas kernels.

    print("KERNEL_OK")
</pallas_src>

<mosaic_0001>
module attributes {stable_mosaic.version = 11 : i64} {
  func.func @_nb_output_kernel(%arg0: i32, %arg1: i32, %arg2: memref<8x128xf32, #tpu.memory_space<vmem>>, %arg3: memref<128x128xf32, #tpu.memory_space<vmem>>, %arg4: memref<128x128xf32, #tpu.memory_space<vmem>>, %arg5: memref<1x128xf32, #tpu.memory_space<vmem>>, %arg6: memref<1x128xf32, #tpu.memory_space<vmem>>, %arg7: memref<8x128xf32, #tpu.memory_space<vmem>>, %arg8: memref<8x128xf32, #tpu.memory_space<vmem>>) attributes {dimension_semantics = [#tpu.dimension_semantics<parallel>, #tpu.dimension_semantics<parallel>], iteration_bounds = array<i64: 2, 1>, scalar_prefetch = 0 : i64, scratch_operands = 0 : i64, tpu.core_type = #tpu.core_type<tc>, window_params = [{transform_indices = @transform_0, window_bounds = array<i64: 8, 128>}, {transform_indices = @transform_1, window_bounds = array<i64: 128, 128>}, {transform_indices = @transform_2, window_bounds = array<i64: 128, 128>}, {transform_indices = @transform_3, window_bounds = array<i64: 1, 128>}, {transform_indices = @transform_4, window_bounds = array<i64: 1, 128>}, {transform_indices = @transform_5, window_bounds = array<i64: 8, 128>}, {transform_indices = @transform_6, window_bounds = array<i64: 8, 128>}]} {
    %c0 = arith.constant 0 : index
    %c0_0 = arith.constant 0 : index
    %0 = vector.load %arg2[%c0, %c0_0] : memref<8x128xf32, #tpu.memory_space<vmem>>, vector<8x128xf32>
    %c0_1 = arith.constant 0 : index
    %c0_2 = arith.constant 0 : index
    %1 = vector.load %arg3[%c0_1, %c0_2] : memref<128x128xf32, #tpu.memory_space<vmem>>, vector<128x128xf32>
    %cst = arith.constant dense<0.000000e+00> : vector<8x128xf32>
    %2 = tpu.matmul %0, %1, %cst {dimension_numbers = #tpu.dot_dimension_numbers<[1], [0], [0], [1], [0, 0, 1, 1], [], []>} : vector<8x128xf32>, vector<128x128xf32>, vector<8x128xf32> -> vector<8x128xf32>
    %c0_3 = arith.constant 0 : index
    %c0_4 = arith.constant 0 : index
    %3 = vector.load %arg5[%c0_3, %c0_4] : memref<1x128xf32, #tpu.memory_space<vmem>>, vector<1x128xf32>
    %4 = vector.broadcast %3 : vector<1x128xf32> to vector<8x128xf32>
    %5 = arith.addf %2, %4 : vector<8x128xf32>
    %c0_5 = arith.constant 0 : index
    %c0_6 = arith.constant 0 : index
    %6 = vector.load %arg4[%c0_5, %c0_6] : memref<128x128xf32, #tpu.memory_space<vmem>>, vector<128x128xf32>
    %cst_7 = arith.constant dense<0.000000e+00> : vector<8x128xf32>
    %7 = tpu.matmul %0, %6, %cst_7 {dimension_numbers = #tpu.dot_dimension_numbers<[1], [0], [0], [1], [0, 0, 1, 1], [], []>} : vector<8x128xf32>, vector<128x128xf32>, vector<8x128xf32> -> vector<8x128xf32>
    %c0_8 = arith.constant 0 : index
    %c0_9 = arith.constant 0 : index
    %8 = vector.load %arg6[%c0_8, %c0_9] : memref<1x128xf32, #tpu.memory_space<vmem>>, vector<1x128xf32>
    %9 = vector.broadcast %8 : vector<1x128xf32> to vector<8x128xf32>
    %10 = arith.addf %7, %9 : vector<8x128xf32>
    %cst_10 = arith.constant 0.000000e+00 : f32
    %11 = vector.broadcast %cst_10 : f32 to vector<8x128xf32>
    %12 = arith.maximumf %5, %11 : vector<8x128xf32>
    %13 = math.absf %5 : vector<8x128xf32>
    %cst_11 = arith.constant 0.000000e+00 : f32
    %14 = vector.broadcast %cst_11 : f32 to vector<8x128xf32>
    %15 = arith.subf %14, %13 : vector<8x128xf32>
    %16 = math.exp %15 : vector<8x128xf32>
    %17 = math.log1p %16 : vector<8x128xf32>
    %18 = arith.addf %12, %17 : vector<8x128xf32>
    %c0_12 = arith.constant 0 : index
    %c0_13 = arith.constant 0 : index
    %19 = vector.load %arg7[%c0_12, %c0_13] : memref<8x128xf32, #tpu.memory_space<vmem>>, vector<8x128xf32>
    tpu.vector_store %arg7[%c0_12, %c0_13], %18 {strides = array<i32>} : memref<8x128xf32, #tpu.memory_space<vmem>>, vector<8x128xf32>,
    %cst_14 = arith.constant 0.000000e+00 : f32
    %20 = vector.broadcast %cst_14 : f32 to vector<8x128xf32>
    %21 = arith.maximumf %10, %20 : vector<8x128xf32>
    %22 = math.absf %10 : vector<8x128xf32>
    %cst_15 = arith.constant 0.000000e+00 : f32
    %23 = vector.broadcast %cst_15 : f32 to vector<8x128xf32>
    %24 = arith.subf %23, %22 : vector<8x128xf32>
    %25 = math.exp %24 : vector<8x128xf32>
    %26 = math.log1p %25 : vector<8x128xf32>
    %27 = arith.addf %21, %26 : vector<8x128xf32>
    %c0_16 = arith.constant 0 : index
    %c0_17 = arith.constant 0 : index
    %28 = vector.load %arg8[%c0_16, %c0_17] : memref<8x128xf32, #tpu.memory_space<vmem>>, vector<8x128xf32>
    tpu.vector_store %arg8[%c0_16, %c0_17], %27 {strides = array<i32>} : memref<8x128xf32, #tpu.memory_space<vmem>>, vector<8x128xf32>,
    return
  }
  func.func @transform_0(%arg0: i32, %arg1: i32) -> (i32, i32) {
    %c0_i32 = arith.constant 0 : i32
    %c0_i32_0 = arith.constant 0 : i32
    return %arg1, %c0_i32 : i32, i32
  }
  func.func @transform_1(%arg0: i32, %arg1: i32) -> (i32, i32) {
    %c0_i32 = arith.constant 0 : i32
    %c0_i32_0 = arith.constant 0 : i32
    return %c0_i32, %arg0 : i32, i32
  }
  func.func @transform_2(%arg0: i32, %arg1: i32) -> (i32, i32) {
    %c0_i32 = arith.constant 0 : i32
    %c0_i32_0 = arith.constant 0 : i32
    return %c0_i32, %arg0 : i32, i32
  }
  func.func @transform_3(%arg0: i32, %arg1: i32) -> (i32, i32) {
    %c0_i32 = arith.constant 0 : i32
    %c0_i32_0 = arith.constant 0 : i32
    return %c0_i32, %arg0 : i32, i32
  }
  func.func @transform_4(%arg0: i32, %arg1: i32) -> (i32, i32) {
    %c0_i32 = arith.constant 0 : i32
    %c0_i32_0 = arith.constant 0 : i32
    return %c0_i32, %arg0 : i32, i32
  }
  func.func @transform_5(%arg0: i32, %arg1: i32) -> (i32, i32) {
    %c0_i32 = arith.constant 0 : i32
    return %arg1, %arg0 : i32, i32
  }
  func.func @transform_6(%arg0: i32, %arg1: i32) -> (i32, i32) {
    %c0_i32 = arith.constant 0 : i32
    return %arg1, %arg0 : i32, i32
  }
}

</mosaic_0001>

<bundles_post_ra>
// kernel: nb_full_dispersion_forward.1
= control target key start
LH: loop header
LB: loop body
LE: loop exit
PB: predicated region body
PF: predicated region fallthrough
CT: control target
= control target key end

     0   :  { %s1319_s0 = inlined_call_operand.vmem [shape: f32[8,128], index: 0, kind: input, shape index: {}]   ;;  %s1320_s1 = inlined_call_operand.vmem [shape: f32[128,256], index: 1, kind: input, shape index: {}]   ;;  %s1321_s2 = inlined_call_operand.vmem [shape: f32[128,256], index: 2, kind: input, shape index: {}]   ;;  %s1322_s3 = inlined_call_operand.vmem [shape: f32[1,256], index: 3, kind: input, shape index: {}]   ;;  %s1323_s4 = inlined_call_operand.vmem [shape: f32[1,256], index: 4, kind: input, shape index: {}]   ;;  %s1324_s5 = inlined_call_operand.hbm [shape: f32[8,256], index: 5, kind: output, shape index: {0}]   ;;  %s1325_s6 = inlined_call_operand.hbm [shape: f32[8,256], index: 6, kind: output, shape index: {1}]  }
   0x1   :  { %1326 = sst [smem:[#allocation10_spill]] %s1319_s0 }
   0x2   :  { %12 = vsyncpa [#allocation5], 0 }
   0x3   :  { %14 = vsyncpa [#allocation5 + $0x1], 0 }
   0x4   :  { %15 = vsyncpa [#allocation7], 0 }
   0x5   :  { %17 = vsyncpa [#allocation7 + $0x1], 0  ;;  %s1082_s21 = smov 0   ;;  %s1084_s22 = smov 0  }
   0x6   :  { %s1086_s23 = smov 0   ;;  %s1088_s24 = smov 0  }
   0x7   :  { %s1090_s25 = smov 0   ;;  %s1092_s26 = smov 0  }
   0x8 LB: > { %s845_s27 = sadd.s32 4294967295, %s1045_s26   ;;  %s846_s28 = sadd.s32 4294967294, %s1045_s26   ;;  %s1045_s26 = sphi %s1092_s26, %s23_s26   ;;  %s1041_s25 = sphi %s1090_s25, %s1335_s25   ;;  %s1037_s24 = sphi %s1088_s24, %s1334_s24   ;;  %s1033_s23 = sphi %s1086_s23, %s1333_s23   ;;  %s1029_s22 = sphi %s1084_s22, %s1332_s22   ;;  %s1025_s21 = sphi %s1082_s21, %s1331_s21  }
   0x9   : > { %s35_s29 = sadd.s32 1, %s1041_s25  ;;  %s68_s30 = sadd.s32 1, %s1033_s23 }
   0xa   : > { %p37_p0 = scmp.ge.s32.totalorder %s35_s29, 2  ;;  %p75_p1 = scmp.ne.s32.totalorder %s1033_s23, %s1029_s22 }
   0xb   : > { %p76_p2 = scmp.eq.s32.totalorder %s1045_s26, 0  ;;  %p185_p3 = scmp.eq.s32.totalorder %s845_s27, 1 }
   0xc   : > { %s1337_s29 = smov (%p37_p0, %s35_s29), 0  ;;  %p190_p6 = scmp.ne.s32.totalorder %s1029_s22, %s1025_s21 }
   0xd   : > { %p1121_p4 = por %p76_p2, %p75_p1  ;;  %p1125_p5 = por %p185_p3, %p75_p1 }
   0xe   : > { %s65_s9 = ssub.s32 %s1041_s25, %s1337_s29  ;;  %p191_p8 = scmp.eq.s32.totalorder %s846_s28, 1 }
   0xf   : > { %p66_p7 = scmp.eq.s32.totalorder %s65_s9, 0  ;;  %p849_p10 = scmp.ge.s32.totalorder %s1045_s26, 2 }
  0x10   : > { %p1136_p9 = por %p191_p8, %p190_p6 }
  0x11   : > { %s1134_s10 = scalar_select %p66_p7, %s1033_s23, %s68_s30  }
  0x12   : > { %242 = sbr.rel (%p849_p10) target bundleno = 63 (0x3f), region = 20 }
  0x17   : > { %245 = sbr.rel (!%p1121_p4) target bundleno = 43 (0x2b), region = 24  ;;  %s247_s12 = sand.u32 (%p1121_p4), 1, %s1033_s23  }
  0x18   : > { %s851_s13 = sshll.u32 (%p1121_p4), %s1041_s25, 3  ;;  %s850_s14 = sshll.u32 (%p1121_p4), %s247_s12, 7 }
  0x19   : > { %s1150_s17 = scalar_lea.vmem (%p1121_p4), %s1320_s1, %s851_s13  ;;  %s249_s18 = scalar_lea.vmem (%p1121_p4), [#allocation2], %s850_s14 }
  0x1a   : > { %v310_v0 = vld [vmem:[%s1150_s17] sm:$0xff] (%p1121_p4)  ;;  %v312_v1 = vld [vmem:[%s1150_s17 + $0x10] sm:$0xff] (%p1121_p4) }
  0x1b   : > { %v314_v2 = vld [vmem:[%s1150_s17 + $0x20] sm:$0xff] (%p1121_p4)  ;;  %311 = vst [vmem:[%s249_s18] sm:$0xff] (%p1121_p4), %v310_v0  ;;  %v316_v3 = vld [vmem:[%s1150_s17 + $0x30] sm:$0xff] (%p1121_p4) }
  0x1c   : > { %313 = vst [vmem:[%s249_s18 + $0x8] sm:$0xff] %v312_v1  ;;  %v318_v4 = vld [vmem:[%s1150_s17 + $0x40] sm:$0xff]  ;;  %v320_v5 = vld [vmem:[%s1150_s17 + $0x50] sm:$0xff] }
  0x1d   : > { %315 = vst [vmem:[%s249_s18 + $0x10] sm:$0xff] %v314_v2  ;;  %v322_v6 = vld [vmem:[%s1150_s17 + $0x60] sm:$0xff]  ;;  %v324_v7 = vld [vmem:[%s1150_s17 + $0x70] sm:$0xff] }
  0x1e   : > { %317 = vst [vmem:[%s249_s18 + $0x18] sm:$0xff] %v316_v3  ;;  %v326_v8 = vld [vmem:[%s1150_s17 + $0x80] sm:$0xff]  ;;  %v328_v9 = vld [vmem:[%s1150_s17 + $0x90] sm:$0xff] }
  0x1f   : > { %319 = vst [vmem:[%s249_s18 + $0x20] sm:$0xff] %v318_v4  ;;  %v330_v10 = vld [vmem:[%s1150_s17 + $0xa0] sm:$0xff]  ;;  %v332_v11 = vld [vmem:[%s1150_s17 + $0xb0] sm:$0xff] }
  0x20   : > { %321 = vst [vmem:[%s249_s18 + $0x28] sm:$0xff] %v320_v5  ;;  %v334_v12 = vld [vmem:[%s1150_s17 + $0xc0] sm:$0xff]  ;;  %v336_v13 = vld [vmem:[%s1150_s17 + $0xd0] sm:$0xff] }
  0x21   : > { %323 = vst [vmem:[%s249_s18 + $0x30] sm:$0xff] %v322_v6  ;;  %v338_v14 = vld [vmem:[%s1150_s17 + $0xe0] sm:$0xff]  ;;  %v340_v15 = vld [vmem:[%s1150_s17 + $0xf0] sm:$0xff] }
  0x22   : > { %325 = vst [vmem:[%s249_s18 + $0x38] sm:$0xff] %v324_v7 }
  0x23   : > { %327 = vst [vmem:[%s249_s18 + $0x40] sm:$0xff] %v326_v8 }
  0x24   : > { %329 = vst [vmem:[%s249_s18 + $0x48] sm:$0xff] %v328_v9 }
  0x25   : > { %331 = vst [vmem:[%s249_s18 + $0x50] sm:$0xff] %v330_v10 }
  0x26   : > { %333 = vst [vmem:[%s249_s18 + $0x58] sm:$0xff] %v332_v11 }
  0x27   : > { %335 = vst [vmem:[%s249_s18 + $0x60] sm:$0xff] %v334_v12 }
  0x28   : > { %337 = vst [vmem:[%s249_s18 + $0x68] sm:$0xff] %v336_v13 }
  0x29   : > { %339 = vst [vmem:[%s249_s18 + $0x70] sm:$0xff] %v338_v14 }
  0x2a   : > { %341 = vst [vmem:[%s249_s18 + $0x78] sm:$0xff] %v340_v15 }
  0x2b PF: > { %347 = sbr.rel (!%p1121_p4) target bundleno = 63 (0x3f), region = 62  ;;  %s349_s19 = sand.u32 (%p1121_p4), 1, %s1033_s23  }
  0x2c   : > { %s853_s20 = sshll.u32 (%p1121_p4), %s1041_s25, 3  ;;  %s852_s27 = sshll.u32 (%p1121_p4), %s349_s19, 7 }
  0x2d   : > { %s1175_s9 = scalar_lea.vmem (%p1121_p4), %s1321_s2, %s853_s20  ;;  %s351_s7 = scalar_lea.vmem (%p1121_p4), [#allocation3], %s852_s27 }
  0x2e   : > { %v412_v16 = vld [vmem:[%s1175_s9] sm:$0xff] (%p1121_p4)  ;;  %v414_v17 = vld [vmem:[%s1175_s9 + $0x10] sm:$0xff] (%p1121_p4) }
  0x2f   : > { %v416_v18 = vld [vmem:[%s1175_s9 + $0x20] sm:$0xff] (%p1121_p4)  ;;  %413 = vst [vmem:[%s351_s7] sm:$0xff] (%p1121_p4), %v412_v16  ;;  %v418_v19 = vld [vmem:[%s1175_s9 + $0x30] sm:$0xff] (%p1121_p4) }
  0x30   : > { %415 = vst [vmem:[%s351_s7 + $0x8] sm:$0xff] %v414_v17  ;;  %v420_v20 = vld [vmem:[%s1175_s9 + $0x40] sm:$0xff]  ;;  %v422_v21 = vld [vmem:[%s1175_s9 + $0x50] sm:$0xff] }
  0x31   : > { %417 = vst [vmem:[%s351_s7 + $0x10] sm:$0xff] %v416_v18  ;;  %v424_v22 = vld [vmem:[%s1175_s9 + $0x60] sm:$0xff]  ;;  %v426_v23 = vld [vmem:[%s1175_s9 + $0x70] sm:$0xff] }
  0x32   : > { %419 = vst [vmem:[%s351_s7 + $0x18] sm:$0xff] %v418_v19  ;;  %v428_v24 = vld [vmem:[%s1175_s9 + $0x80] sm:$0xff]  ;;  %v430_v25 = vld [vmem:[%s1175_s9 + $0x90] sm:$0xff] }
  0x33   : > { %421 = vst [vmem:[%s351_s7 + $0x20] sm:$0xff] %v420_v20  ;;  %v432_v26 = vld [vmem:[%s1175_s9 + $0xa0] sm:$0xff]  ;;  %v434_v27 = vld [vmem:[%s1175_s9 + $0xb0] sm:$0xff] }
  0x34   : > { %423 = vst [vmem:[%s351_s7 + $0x28] sm:$0xff] %v422_v21  ;;  %v436_v28 = vld [vmem:[%s1175_s9 + $0xc0] sm:$0xff]  ;;  %v438_v29 = vld [vmem:[%s1175_s9 + $0xd0] sm:$0xff] }
  0x35   : > { %425 = vst [vmem:[%s351_s7 + $0x30] sm:$0xff] %v424_v22  ;;  %v440_v30 = vld [vmem:[%s1175_s9 + $0xe0] sm:$0xff]  ;;  %v442_v31 = vld [vmem:[%s1175_s9 + $0xf0] sm:$0xff] }
  0x36   : > { %427 = vst [vmem:[%s351_s7 + $0x38] sm:$0xff] %v426_v23 }
  0x37   : > { %429 = vst [vmem:[%s351_s7 + $0x40] sm:$0xff] %v428_v24 }
  0x38   : > { %431 = vst [vmem:[%s351_s7 + $0x48] sm:$0xff] %v430_v25 }
  0x39   : > { %433 = vst [vmem:[%s351_s7 + $0x50] sm:$0xff] %v432_v26 }
  0x3a   : > { %435 = vst [vmem:[%s351_s7 + $0x58] sm:$0xff] %v434_v27 }
  0x3b   : > { %437 = vst [vmem:[%s351_s7 + $0x60] sm:$0xff] %v436_v28 }
  0x3c   : > { %439 = vst [vmem:[%s351_s7 + $0x68] sm:$0xff] %v438_v29 }
  0x3d   : > { %441 = vst [vmem:[%s351_s7 + $0x70] sm:$0xff] %v440_v30 }
  0x3e   : > { %443 = vst [vmem:[%s351_s7 + $0x78] sm:$0xff] %v442_v31 }
  0x3f PF: > { %p854_p11 = scmp.ge.s32.totalorder %s1045_s26, 1  ;;  %p460_p12 = scmp.lt.s32.totalorder %s1045_s26, 3 }
  0x41   : > { %p461_p13 = pnand %p854_p11, %p460_p12 }
  0x42   : > { %s1196_s12 = sand.u32 (!%p461_p13), 1, %s1029_s22   ;;  %p526_p0 = scmp.lt.s32.totalorder (!%p461_p13), %s1037_s24, 1 }
  0x43   : > { %464 = sbr.rel (%p461_p13) target bundleno = 274 (0x112), region = 108  ;;  %s855_s13 = sshll.u32 (!%p461_p13), %s1196_s12, 7 }
  0x44   : > { %s1199_s14 = scalar_lea.vmem (!%p461_p13), [#allocation2], %s855_s13  ;;  %s1202_s15 = scalar_lea.vmem (!%p461_p13), [#allocation3], %s855_s13 }
  0x45   : > { %s1330_s0 = sld [smem:[#allocation10_spill]] (!%p461_p13) }
  0x48   : > { %v548_v32 = vld [vmem:[%s1199_s14 + $0x78] sm:$0xff]  ;;  %v547_v34 = vld [vmem:[%s1199_s14 + $0x70] sm:$0xff]  ;;  %v546_v36 = vld [vmem:[%s1199_s14 + $0x68] sm:$0xff]  ;;  %s1213_s16 = scalar_select %p526_p0, %s1037_s24, 1 }
  0x49   : > { %v588_v33 = vld [vmem:[%s1202_s15 + $0x78] sm:$0xff]  ;;  %553 = vmatpush.msra.mxu0 %v548_v32  ;;  %v587_v35 = vld [vmem:[%s1202_s15 + $0x70] sm:$0xff]  ;;  %v586_v37 = vld [vmem:[%s1202_s15 + $0x68] sm:$0xff] }
  0x4a   : > { %593 = vmatpush.msra.mxu1 %v588_v33  ;;  %v545_v38 = vld [vmem:[%s1199_s14 + $0x60] sm:$0xff]  ;;  %v544_v40 = vld [vmem:[%s1199_s14 + $0x58] sm:$0xff]  ;;  %v543_v42 = vld [vmem:[%s1199_s14 + $0x50] sm:$0xff]  ;;  %s528_s19 = scalar_lea.vmem %s1322_s3, %s1213_s16  ;;  %s531_s28 = scalar_lea.vmem %s1323_s4, %s1213_s16 }
  0x4b   : > { %554 = vmatpush.msra.mxu0 %v547_v34  ;;  %v585_v39 = vld [vmem:[%s1202_s15 + $0x60] sm:$0xff]  ;;  %v584_v41 = vld [vmem:[%s1202_s15 + $0x58] sm:$0xff]  ;;  %v583_v43 = vld [vmem:[%s1202_s15 + $0x50] sm:$0xff] }
  0x4c   : > { %594 = vmatpush.msra.mxu1 %v587_v35  ;;  %v542_v44 = vld [vmem:[%s1199_s14 + $0x48] sm:$0xff]  ;;  %v541_v46 = vld [vmem:[%s1199_s14 + $0x40] sm:$0xff]  ;;  %v540_v48 = vld [vmem:[%s1199_s14 + $0x38] sm:$0xff] }
  0x4d   : > { %555 = vmatpush.msra.mxu0 %v546_v36  ;;  %v582_v45 = vld [vmem:[%s1202_s15 + $0x48] sm:$0xff]  ;;  %v581_v47 = vld [vmem:[%s1202_s15 + $0x40] sm:$0xff]  ;;  %v580_v49 = vld [vmem:[%s1202_s15 + $0x38] sm:$0xff] }
  0x4e   : > { %595 = vmatpush.msra.mxu1 %v586_v37  ;;  %v539_v50 = vld [vmem:[%s1199_s14 + $0x30] sm:$0xff]  ;;  %v538_v52 = vld [vmem:[%s1199_s14 + $0x28] sm:$0xff]  ;;  %v537_v54 = vld [vmem:[%s1199_s14 + $0x20] sm:$0xff] }
  0x4f   : > { %556 = vmatpush.msra.mxu0 %v545_v38  ;;  %v579_v51 = vld [vmem:[%s1202_s15 + $0x30] sm:$0xff]  ;;  %v578_v53 = vld [vmem:[%s1202_s15 + $0x28] sm:$0xff]  ;;  %v577_v55 = vld [vmem:[%s1202_s15 + $0x20] sm:$0xff] }
  0x50   : > { %596 = vmatpush.msra.mxu1 %v585_v39  ;;  %v536_v56 = vld [vmem:[%s1199_s14 + $0x18] sm:$0xff]  ;;  %v535_v58 = vld [vmem:[%s1199_s14 + $0x10] sm:$0xff]  ;;  %v534_v60 = vld [vmem:[%s1199_s14 + $0x8] sm:$0xff] }
  0x51   : > { %557 = vmatpush.msra.mxu0 %v544_v40  ;;  %v576_v57 = vld [vmem:[%s1202_s15 + $0x18] sm:$0xff]  ;;  %v575_v59 = vld [vmem:[%s1202_s15 + $0x10] sm:$0xff]  ;;  %v574_v61 = vld [vmem:[%s1202_s15 + $0x8] sm:$0xff] }
  0x52   : > { %597 = vmatpush.msra.mxu1 %v584_v41  ;;  %v533_v62 = vld [vmem:[%s1199_s14] sm:$0xff]  ;;  %s857_s14 = sshll.u32 %s1196_s12, 3 }
  0x53   : > { %558 = vmatpush.msra.mxu0 %v543_v42  ;;  %v573_v63 = vld [vmem:[%s1202_s15] sm:$0xff]  ;;  %s861_s15 = sshll.u32 %s1037_s24, 3  ;;  %s1263_s24 = scalar_lea.vmem [#allocation6], %s857_s14 }
  0x54   : > { %598 = vmatpush.msra.mxu1 %v583_v43  ;;  %v532_v0 = vld [vmem:[%s1330_s0] sm:$0xff]  ;;  %s663_s18 = scalar_lea.hbm %s1324_s5, %s861_s15  ;;  %s679_s27 = scalar_lea.hbm %s1325_s6, %s861_s15 }
  0x55   : > { %559 = vmatpush.msra.mxu0 %v542_v44  ;;  %v925_v1 = vld [vmem:[%s528_s19] ss:$0 sm:$0xff]  ;;  %s667_s9 = sshll.u32 %s663_s18, 4  ;;  %s681_s7 = sshll.u32 %s1263_s24, 4  ;;  %s668_s9 = int_to_ptr.hbm [resolvable:$true] %s667_s9  ;;  %s1266_s7 = int_to_ptr.vmem [resolvable:$true] %s681_s7 }
  0x56   : > { %599 = vmatpush.msra.mxu1 %v582_v45  ;;  %v926_v2 = vld [vmem:[%s531_s28] ss:$0 sm:$0xff]  ;;  %s514_s28 = scalar_lea.vmem [#allocation4], %s857_s14  ;;  %s683_s13 = sshll.u32 %s679_s27, 4  ;;  %s1268_s13 = int_to_ptr.hbm [resolvable:$true] %s683_s13 }
  0x57   : > { %560 = vmatpush.msra.mxu0 %v541_v46  ;;  %s665_s30 = sshll.u32 %s514_s28, 4  ;;  %s646_s14 = scalar_lea.sflag [#allocation5], %s1196_s12  ;;  %s666_s30 = int_to_ptr.vmem [resolvable:$true] %s665_s30 }
  0x58   : > { %600 = vmatpush.msra.mxu1 %v581_v47  ;;  %s949_s15 = sshra.s32 %s668_s9, 4  ;;  %s955_s19 = scalar_lea.hbm %s1324_s5, 16  ;;  %s950_s15 = int_to_ptr.hbm [resolvable:$true] %s949_s15 }
  0x59   : > { %561 = vmatpush.msra.mxu0 %v540_v48  ;;  %s951_s16 = scalar_lea.hbm %s950_s15, 8  ;;  %p956_p4 = scmp.lt.s32.totalorder %s950_s15, %s1324_s5 }
  0x5a   : > { %601 = vmatpush.msra.mxu1 %v580_v49  ;;  %p952_p1 = scmp.ne.s32.totalorder %s950_s15, %s951_s16  ;;  %p957_p6 = scmp.lt.s32.totalorder %s955_s19, %s951_s16 }
  0x5b   : > { %562 = vmatpush.msra.mxu0 %v539_v50 }
  0x5c   : > { %602 = vmatpush.msra.mxu1 %v579_v51  ;;  %p953_p2 = pnand %p952_p1, %p1125_p5  ;;  %p958_p7 = por %p957_p6, %p956_p4 }
  0x5d   : > { %563 = vmatpush.msra.mxu0 %v538_v52 }
  0x5e   : > { %603 = vmatpush.msra.mxu1 %v578_v53  ;;  %p954_p3 = pneg %p953_p2 }
  0x5f   : > { %564 = vmatpush.msra.mxu0 %v537_v54 }
  0x60   : > { %604 = vmatpush.msra.mxu1 %v577_v55  ;;  %p959_p8 = pnand %p958_p7, %p954_p3 }
  0x61   : > { %565 = vmatpush.msra.mxu0 %v536_v56 }
  0x62   : > { %605 = vmatpush.msra.mxu1 %v576_v57 }
  0x63   : > { %566 = vmatpush.msra.mxu0 %v535_v58 }
  0x64   : > { %606 = vmatpush.msra.mxu1 %v575_v59 }
  0x65   : > { %567 = vmatpush.msra.mxu0 %v534_v60 }
  0x66   : > { %607 = vmatpush.msra.mxu1 %v574_v61 }
  0x67   : > { %568 = vmatpush.msra.mxu0 %v533_v62 }
  0x68   : > { %608 = vmatpush.msra.mxu1 %v573_v63  ;;  %569 = vmatmul.f32.vlgmr.msra.gmra.mxu0 %v532_v0 }
  0x69   : > { %609 = vmatmul.f32.vlgmr.msra.gmra.mxu1 %v532_v0 }
  0xe5   : > { %v570_v3 = vpop.f32.mrf.mxu0 }
  0xe6   : > { %v610_v4 = vpop.f32.mrf.mxu1  ;;  %v571_v5 = vadd.f32 %v925_v1, %v570_v3 }
  0xe7   : > { %v611_v6 = vadd.f32 %v926_v2, %v610_v4 }
  0xe8   : > { %v614_v7 = vand.u32 2147483647, %v571_v5  ;;  %v613_v27 = vmax.f32 %v571_v5, 0.0 }
  0xe9   : > { %v630_v8 = vand.u32 2147483647, %v611_v6  ;;  %v629_v31 = vmax.f32 %v611_v6, 0.0 }
  0xea   : > { %v615_v9 = vsub.f32 0.0, %v614_v7 }
  0xeb   : > { %v631_v10 = vsub.f32 0.0, %v630_v8 }
  0xec   : > { %v616_v11 = vmul.f32 1.442695, %v615_v9 }
  0xed   : > { %v632_v12 = vmul.f32 1.442695, %v631_v10 }
  0xee   : > { %927 = vpow2.f32 %v616_v11 }
  0xef   : > { %929 = vpow2.f32 %v632_v12 }
  0xf4   : > { %v928_v13 = vpop.eup %927 }
  0xf5   : > { %v930_v14 = vpop.eup %929  ;;  %v618_v15 = vadd.f32 1.0, %v928_v13  ;;  %v621_v16 = vmul.f32 -0.5, %v928_v13  ;;  %v624_v20 = vand.u32 2147483647, %v928_v13 }
  0xf6   : > { %v634_v17 = vadd.f32 1.0, %v930_v14  ;;  %v637_v18 = vmul.f32 -0.5, %v930_v14  ;;  %v640_v22 = vand.u32 2147483647, %v930_v14 }
  0xf7   : > { %931 = vlog2.f32 %v618_v15  ;;  %v622_v19 = vadd.f32 1.0, %v621_v16  ;;  %vm625_vm0 = vcmp.lt.f32.partialorder %v624_v20, 0.0004427343 }
  0xf8   : > { %933 = vlog2.f32 %v634_v17  ;;  %v638_v21 = vadd.f32 1.0, %v637_v18  ;;  %vm641_vm1 = vcmp.lt.f32.partialorder %v640_v22, 0.0004427343 }
  0xf9   : > { %v623_v26 = vmul.f32 %v928_v13, %v622_v19 }
  0xfa   : > { %v639_v29 = vmul.f32 %v930_v14, %v638_v21 }
  0xfd   : > { %v932_v23 = vpop.eup %931 }
  0xfe   : > { %v934_v24 = vpop.eup %933  ;;  %v620_v25 = vmul.f32 0.6931472, %v932_v23 }
  0xff   : > { %v636_v28 = vmul.f32 0.6931472, %v934_v24 }
 0x100   : > { %v626_v30 = vsel %vm625_vm0, %v623_v26, %v620_v25 }
 0x101   : > { %v627_v32 = vadd.f32 %v626_v30, %v613_v27  ;;  %v642_v33 = vsel %vm641_vm1, %v639_v29, %v636_v28 }
 0x102   : > { %v643_v34 = vadd.f32 %v642_v33, %v629_v31 }
 0x103   : > { %628 = vst [vmem:[%s514_s28] sm:$0xff] %v627_v32 }
 0x104   : > { %962 = shalt.err (!%p959_p8)
}
 0x105   : > { %865 = dma.vmem_to_hbm [thread:$0]  (%p1125_p5), %s666_s30, 128, %s668_s9, %s646_s14   ;;  %644 = vst [vmem:[%s1263_s24] sm:$0xff] %v643_v34 }
 0x106   : > { %s651_s28 = scalar_lea.sflag [#allocation7], %s1196_s12  ;;  %s977_s0 = sshra.s32 %s1268_s13, 4  ;;  %s978_s0 = int_to_ptr.hbm [resolvable:$true] %s977_s0 }
 0x107   : > { %s979_s17 = scalar_lea.hbm %s978_s0, 8  ;;  %s983_s18 = scalar_lea.hbm %s1325_s6, 16 }
 0x108   : > { %p980_p11 = scmp.ne.s32.totalorder %s978_s0, %s979_s17  ;;  %p984_p0 = scmp.lt.s32.totalorder %s978_s0, %s1325_s6 }
 0x109   : > { %p985_p1 = scmp.lt.s32.totalorder %s983_s18, %s979_s17 }
 0x10a   : > { %p981_p12 = pnand %p980_p11, %p1125_p5 }
 0x10b   : > { %p986_p2 = por %p985_p1, %p984_p0 }
 0x10c   : > { %p982_p13 = pneg %p981_p12 }
 0x10e   : > { %p987_p3 = pnand %p986_p2, %p982_p13 }
 0x110   : > { %990 = shalt.err (!%p987_p3)
}
 0x111   : > { %866 = dma.vmem_to_hbm [thread:$0]  (%p1125_p5), %s1266_s7, 128, %s1268_s13, %s651_s28  }
 0x112 PF: > { %s695_s12 = sand.u32 1, %s1025_s21   ;;  %p870_p4 = pnand %p849_p10, %p1136_p9 }
 0x113   : > { %s696_s30 = scalar_lea.sflag [#allocation5], %s695_s12 }
 0x114   : > { %p871_p6 = pneg %p870_p4 }
 0x116   : > { %1016 = dma.done.wait (%p871_p6), %s696_s30, 128  }
 0x117   : > { %1018 = vsyncadd (%p871_p6), %s696_s30, 4294967168  ;;  %s706_s0 = scalar_lea.sflag [#allocation7], %s695_s12 }
 0x118   : > { %1020 = dma.done.wait (%p871_p6), %s706_s0, 128  }
 0x119   : > { %1022 = vsyncadd (%p871_p6), %s706_s0, 4294967168  ;;  %s23_s26 = sadd.s32 1, %s1045_s26   ;;  %s1331_s21 = smov %s1029_s22 }
 0x11a   : > { %p20_p7 = scmp.ge.s32.totalorder %s23_s26, 4   ;;  %s1332_s22 = smov %s1033_s23 }
 0x11b   : > { %s1333_s23 = smov %s1134_s10  ;;  %s1334_s24 = smov %s1041_s25 }
 0x11c   : > { %s1335_s25 = smov %s1337_s29  ;;  %22 = sbr.rel (!%p20_p7) target bundleno = 8 (0x8), region = 190 }
 0x121   :  { %712 = vsyncpa [#allocation5], 1 }
 0x122   :  { %714 = vsyncpa [#allocation5 + $0x1], 1 }
 0x123   :  { %715 = vsyncpa [#allocation7], 1 }
 0x124   :  { %717 = vsyncpa [#allocation7 + $0x1], 1 }

</bundles_post_ra>
